<compile_context>
chip_gen: v7x
topology: tpu7x:2x2x1
jax: 0.10.0
libtpu: 0.0.40
codegen_flags: <defaults>
</compile_context>

<pallas_src>
import functools

import jax
import jax.numpy as jnp
from jax import lax
from jax.experimental import pallas as pl
from jax.experimental.pallas import tpu as pltpu


def _block_kernel(x_ref, halo_ref, w_ref, p_ref, mask_ref, o_ref, *,
                  kernel_size, eps, mxu_dtype):
    # x_ref:    (1, C, Lt)        input tile, NCL layout (lane axis = L)
    # halo_ref: (1, 1, C, hw)     [left pad cols | right pad cols] (zeros at seq borders)
    # w_ref:    (K, C, C)         conv weight taps, w_ref[k, cout, cin]
    # p_ref:    (C, 3)            packed f32 [conv bias | LN gamma | LN beta]
    # mask_ref: (1, 1, Lt)        mask (broadcast over channels)
    # o_ref:    (1, C, Lt)        output tile
    pad = kernel_size // 2
    _, C, Lt = x_ref.shape

    x = x_ref[0]                                         # (C, Lt)
    xm = x if x.dtype == mxu_dtype else x.astype(mxu_dtype)

    bias = p_ref[:, 0:1]                                 # (C, 1) f32
    gamma = p_ref[:, 1:2]
    beta = p_ref[:, 2:3]
    inv_c = jnp.float32(1.0 / C)
    sqrt_half = jnp.float32(0.7071067811865476)
    epsf = jnp.float32(eps)

    def ln_gelu(acc):                                    # acc: (C, n) f32
        mu = jnp.sum(acc, axis=0, keepdims=True) * inv_c
        d = acc - mu
        var = jnp.sum(d * d, axis=0, keepdims=True) * inv_c   # two-pass (centered) variance
        y = d * lax.rsqrt(var + epsf) * gamma + beta
        # exact erf GELU (PyTorch nn.GELU default)
        return 0.5 * y * (1.0 + lax.erf(y * sqrt_half))

    # ---- conv interior: K lane-rotated taps (XLU) feeding accumulating MXU dots.
    # rolled_k[:, l] == x[:, (l + k - pad) mod Lt]; the wrap only contaminates the
    # first/last `pad` output columns, which are recomputed exactly below.
    acc = None
    for k in range(kernel_size):
        shift = (pad - k) % Lt
        tap = xm if shift == 0 else pltpu.roll(xm, shift=shift, axis=1)
        c = jnp.dot(w_ref[k], tap, preferred_element_type=jnp.float32)
        acc = c if acc is None else acc + c
    acc = acc + bias

    m = mask_ref[0].astype(jnp.float32)                  # (1, Lt)
    o_ref[0] = (ln_gelu(acc) * m).astype(o_ref.dtype)

    # ---- exact boundary columns (receptive field crosses the tile edge) ----
    if pad > 0:
        halo = halo_ref[0, 0]                            # (C, 2*pad)
        halo = halo if halo.dtype == mxu_dtype else halo.astype(mxu_dtype)
        ls = jnp.concatenate([halo[:, :pad], xm[:, :2 * pad]], axis=1)        # (C, 3*pad)
        rs = jnp.concatenate([xm[:, Lt - 2 * pad:], halo[:, pad:]], axis=1)   # (C, 3*pad)
        eacc = None
        for k in range(kernel_size):
            cols = jnp.concatenate([ls[:, k:k + pad], rs[:, k:k + pad]], axis=1)  # (C, 2*pad)
            c = jnp.dot(w_ref[k], cols, preferred_element_type=jnp.float32)
            eacc = c if eacc is None else eacc + c
        eacc = eacc + bias
        em = jnp.concatenate([m[:, :pad], m[:, Lt - pad:]], axis=1)           # (1, 2*pad)
        ey = (ln_gelu(eacc) * em).astype(o_ref.dtype)
        o_ref[0, :, :pad] = ey[:, :pad]
        o_ref[0, :, Lt - pad:] = ey[:, pad:]


def _vmem_capacity_bytes():
    """Generation-aware physical VMEM; conservative fallback (v7x per-TC) if unknown."""
    try:
        info = pltpu.get_tpu_info()
        for name in ("vmem_capacity_bytes", "vmem_size_bytes", "vmem_bytes"):
            v = getattr(info, name, None)
            if v:
                return int(v)
    except Exception:
        pass
    return 64 * 1024 * 1024


def _choose_lt(L, bytes_per_col, budget_bytes, min_tiles):
    """L-tile size: multiple of 128 (or the full L), within the VMEM budget,
    capped at the 2048-lane sweet spot, and giving >= min_tiles grid steps
    along L when possible (v7x 2nd TensorCore)."""
    if L <= 256:
        if min_tiles > 1 and L == 256:
            return 128
        return L
    cap_cols = max(128, (budget_bytes - (2 << 20)) // max(bytes_per_col, 1))
    if min_tiles > 1:
        cap_cols = min(cap_cols, pl.cdiv(L, min_tiles))
    cap = max(128, min((cap_cols // 128) * 128, 2048, pl.cdiv(L, 128) * 128))
    if L % 128 == 0:
        d = cap
        while d >= 128:
            if L % d == 0:
                return d
            d -= 128
    return cap      # wrapper zero-pads L up to a multiple of this


def _build_halo(x_ncl, lt, pad):
    """(N, T, C, max(2*pad,1)): for each L tile, the `pad` columns just left and
    just right of it (zeros at the sequence borders == Conv1d zero padding)."""
    N, C, L = x_ncl.shape
    T = L // lt
    hw = max(2 * pad, 1)
    if pad == 0 or T == 1:
        return jnp.zeros((N, T, C, hw), x_ncl.dtype)
    z = jnp.zeros((N, C, 1, pad), x_ncl.dtype)
    left_body = x_ncl[:, :, lt - pad: lt - pad + (T - 1) * lt]
    left_body = left_body.reshape(N, C, T - 1, lt)[..., :pad]
    lefts = jnp.concatenate([z, left_body], axis=2)                  # (N,C,T,pad)
    right_body = x_ncl[:, :, lt: lt + (T - 1) * lt]
    right_body = right_body.reshape(N, C, T - 1, lt)[..., :pad]
    rights = jnp.concatenate([right_body, z], axis=2)                # (N,C,T,pad)
    halo = jnp.concatenate([lefts, rights], axis=-1)                 # (N,C,T,2p)
    return jnp.transpose(halo, (0, 2, 1, 3))                         # (N,T,C,2p)


def block_forward(x_ncl, mask_n1l, w_oik, bias, gamma, beta, *,
                  eps=1e-5, lt=None, mxu_dtype=None, out_dtype=None):
    """x_ncl: (N, C, L); mask_n1l: (N, 1, L); w_oik: (C, C, K). Returns (N, C, L)."""
    N, C, L = x_ncl.shape
    Cout, Cin, K = w_oik.shape
    assert Cout == C and Cin == C
    # Even K changes the output length in PyTorch (padding=K//2); only odd K matches.
    assert K % 2 == 1, "Block kernel supports odd kernel_size only"
    pad = K // 2
    hw = max(2 * pad, 1)

    in_dt = jnp.dtype(x_ncl.dtype)
    mxu_dt = jnp.dtype(mxu_dtype) if mxu_dtype is not None else in_dt
    out_dt = jnp.dtype(out_dtype) if out_dtype is not None else in_dt

    vmem_cap = _vmem_capacity_bytes()
    if lt is None:
        bytes_per_col = C * (2 * in_dt.itemsize + 2 * out_dt.itemsize
                             + 3 * mxu_dt.itemsize + 6 * 4) + 8
        min_tiles = 2 if N == 1 else 1          # keep v7x's 2nd TensorCore busy
        lt = _choose_lt(L, bytes_per_col, int(vmem_cap * 0.45), min_tiles)
    assert lt == L or lt % 128 == 0, "L tile must be a multiple of 128 or the full L"
    assert lt >= 2 * pad, "L tile must cover the conv receptive field"

    # Ragged L: zero-pad the tail (mask already zeroes it; result is sliced back).
    Lp = pl.cdiv(L, lt) * lt
    x_p, mask_p = x_ncl, mask_n1l
    if Lp != L:
        x_p = jnp.pad(x_ncl, ((0, 0), (0, 0), (0, Lp - L)))
        mask_p = jnp.pad(mask_n1l, ((0, 0), (0, 0), (0, Lp - L)))
    T = Lp // lt

    w_taps = jnp.transpose(w_oik, (2, 0, 1)).astype(mxu_dt)              # (K, C, C)
    params = jnp.stack([bias, gamma, beta], axis=1).astype(jnp.float32)  # (C, 3)
    halo = _build_halo(x_p, lt, pad)                                     # (N, T, C, hw)

    kernel = functools.partial(_block_kernel, kernel_size=K, eps=float(eps),
                               mxu_dtype=mxu_dt)

    out = pl.pallas_call(
        kernel,
        out_shape=jax.ShapeDtypeStruct((N, C, Lp), out_dt),
        grid_spec=pltpu.PrefetchScalarGridSpec(
            num_scalar_prefetch=0,
            grid=(N, T),
            in_specs=[
                pl.BlockSpec((1, C, lt), lambda n, t: (n, 0, t)),        # x tile
                pl.BlockSpec((1, 1, C, hw), lambda n, t: (n, t, 0, 0)),  # halo cols
                pl.BlockSpec((K, C, C), lambda n, t: (0, 0, 0)),         # conv taps
                pl.BlockSpec((C, 3), lambda n, t: (0, 0)),               # bias/gamma/beta
                pl.BlockSpec((1, 1, lt), lambda n, t: (n, 0, t)),        # mask
            ],
            out_specs=pl.BlockSpec((1, C, lt), lambda n, t: (n, 0, t)),
        ),
        compiler_params=pltpu.CompilerParams(
            dimension_semantics=("parallel", "parallel"),
            vmem_limit_bytes=int(min(vmem_cap * 0.8, 110 * 1024 * 1024))),
    )(x_p, halo, w_taps, params, mask_p)

    if Lp != L:
        out = out[:, :, :L]
    return out


def _reference(x_ncl, mask_n1l, w_oik, bias, gamma, beta, eps=1e-5):
    """Pure-JAX reference mirroring the PyTorch forward."""
    K = w_oik.shape[-1]
    pad = K // 2
    y = lax.conv_general_dilated(
        x_ncl, w_oik, window_strides=(1,), padding=[(pad, pad)],
        dimension_numbers=("NCW", "OIW", "NCW"))
    y = y + bias[None, :, None]
    mu = jnp.mean(y, axis=1, keepdims=True)
    var = jnp.mean((y - mu) ** 2, axis=1, keepdims=True)
    y = (y - mu) * lax.rsqrt(var + eps)
    y = y * gamma[None, :, None] + beta[None, :, None]
    y = 0.5 * y * (1.0 + lax.erf(y / jnp.sqrt(2.0)))
    return y * mask_n1l


def _run_case(N, C, L, K, lt=None, mxu_dtype=None, tol=1e-4):
    key = jax.random.PRNGKey(0)
    k1, k2, k3, k4, k5 = jax.random.split(key, 5)
    w_oik = jax.random.normal(k1, (C, C, K), jnp.float32) / jnp.sqrt(C * K)
    bias = jax.random.normal(k2, (C,), jnp.float32) * 0.1
    gamma = 1.0 + 0.1 * jax.random.normal(k4, (C,), jnp.float32)
    beta = 0.1 * jax.random.normal(k5, (C,), jnp.float32)
    x = jax.random.normal(k3, (N, C, L), jnp.float32)
    lengths = jnp.maximum(1, L - 3 * jnp.arange(N, dtype=jnp.int32))
    mask = (jnp.arange(L)[None, None, :] < lengths[:, None, None]).astype(jnp.float32)

    out = block_forward(x, mask, w_oik, bias, gamma, beta, lt=lt, mxu_dtype=mxu_dtype)
    out = jax.block_until_ready(out)

    ref = _reference(x, mask, w_oik, bias, gamma, beta)
    assert out.shape == (N, C, L)
    err = float(jnp.max(jnp.abs(out - ref)))
    assert err < tol, f"mismatch vs reference (N={N},C={C},L={L},K={K}): {err}"


if __name__ == "__main__":
    # small single-tile case (mirrors the module at toy size)
    _run_case(2, 16, 16, 5)
    # multi L-tile case exercising the halo + boundary-patch path
    _run_case(1, 16, 256, 5, lt=128)
    # ragged L exercising the zero-padding path + auto tile choice (N==1 -> >=2 tiles)
    _run_case(1, 16, 300, 5)
    # bf16 MXU operands (in-kernel cast), f32 accumulation -> looser tolerance
    _run_case(2, 16, 16, 5, mxu_dtype=jnp.bfloat16, tol=1e-1)
    print("KERNEL_OK")
</pallas_src>

<mosaic_0001>
module attributes {stable_mosaic.version = 11 : i64} {
  func.func @_block_kernel(%arg0: i32, %arg1: i32, %arg2: memref<1x16x16xf32, #tpu.memory_space<vmem>>, %arg3: memref<1x1x16x4xf32, #tpu.memory_space<vmem>>, %arg4: memref<5x16x16xf32, #tpu.memory_space<vmem>>, %arg5: memref<16x3xf32, #tpu.memory_space<vmem>>, %arg6: memref<1x1x16xf32, #tpu.memory_space<vmem>>, %arg7: memref<1x16x16xf32, #tpu.memory_space<vmem>>) attributes {dimension_semantics = [#tpu.dimension_semantics<parallel>, #tpu.dimension_semantics<parallel>], iteration_bounds = array<i64: 2, 1>, scalar_prefetch = 0 : i64, scratch_operands = 0 : i64, tpu.core_type = #tpu.core_type<tc>, window_params = [{transform_indices = @transform_0, window_bounds = array<i64: 1, 16, 16>}, {transform_indices = @transform_1, window_bounds = array<i64: 1, 1, 16, 4>}, {pipeline_mode = #tpu.pipeline_mode<synchronous>, transform_indices = @transform_2, window_bounds = array<i64: 5, 16, 16>}, {pipeline_mode = #tpu.pipeline_mode<synchronous>, transform_indices = @transform_3, window_bounds = array<i64: 16, 3>}, {transform_indices = @transform_4, window_bounds = array<i64: 1, 1, 16>}, {transform_indices = @transform_5, window_bounds = array<i64: 1, 16, 16>}]} {
    %c0 = arith.constant 0 : index
    %c0_0 = arith.constant 0 : index
    %c0_1 = arith.constant 0 : index
    %0 = vector.load %arg2[%c0, %c0_0, %c0_1] : memref<1x16x16xf32, #tpu.memory_space<vmem>>, vector<1x16x16xf32>
    %1 = vector.shape_cast %0 : vector<1x16x16xf32> to vector<16x16xf32>
    %c0_2 = arith.constant 0 : index
    %c0_3 = arith.constant 0 : index
    %2 = vector.load %arg5[%c0_2, %c0_3] : memref<16x3xf32, #tpu.memory_space<vmem>>, vector<16x1xf32>
    %c0_4 = arith.constant 0 : index
    %c1 = arith.constant 1 : index
    %3 = vector.load %arg5[%c0_4, %c1] : memref<16x3xf32, #tpu.memory_space<vmem>>, vector<16x1xf32>
    %c0_5 = arith.constant 0 : index
    %c2 = arith.constant 2 : index
    %4 = vector.load %arg5[%c0_5, %c2] : memref<16x3xf32, #tpu.memory_space<vmem>>, vector<16x1xf32>
    %c2_i32 = arith.constant 2 : i32
    %5 = tpu.dynamic_rotate %1 by %c2_i32 dim 1 : vector<16x16xf32>, i32 -> vector<16x16xf32>
    %c0_6 = arith.constant 0 : index
    %c0_7 = arith.constant 0 : index
    %c0_8 = arith.constant 0 : index
    %6 = vector.load %arg4[%c0_6, %c0_7, %c0_8] : memref<5x16x16xf32, #tpu.memory_space<vmem>>, vector<1x16x16xf32>
    %7 = vector.shape_cast %6 : vector<1x16x16xf32> to vector<16x16xf32>
    %cst = arith.constant dense<0.000000e+00> : vector<16x16xf32>
    %8 = tpu.matmul %7, %5, %cst {dimension_numbers = #tpu.dot_dimension_numbers<[1], [0], [0], [1], [0, 0, 1, 1], [], []>} : vector<16x16xf32>, vector<16x16xf32>, vector<16x16xf32> -> vector<16x16xf32>
    %c1_i32 = arith.constant 1 : i32
    %9 = tpu.dynamic_rotate %1 by %c1_i32 dim 1 : vector<16x16xf32>, i32 -> vector<16x16xf32>
    %c1_9 = arith.constant 1 : index
    %c0_10 = arith.constant 0 : index
    %c0_11 = arith.constant 0 : index
    %10 = vector.load %arg4[%c1_9, %c0_10, %c0_11] : memref<5x16x16xf32, #tpu.memory_space<vmem>>, vector<1x16x16xf32>
    %11 = vector.shape_cast %10 : vector<1x16x16xf32> to vector<16x16xf32>
    %cst_12 = arith.constant dense<0.000000e+00> : vector<16x16xf32>
    %12 = tpu.matmul %11, %9, %cst_12 {dimension_numbers = #tpu.dot_dimension_numbers<[1], [0], [0], [1], [0, 0, 1, 1], [], []>} : vector<16x16xf32>, vector<16x16xf32>, vector<16x16xf32> -> vector<16x16xf32>
    %13 = arith.addf %8, %12 : vector<16x16xf32>
    %c2_13 = arith.constant 2 : index
    %c0_14 = arith.constant 0 : index
    %c0_15 = arith.constant 0 : index
    %14 = vector.load %arg4[%c2_13, %c0_14, %c0_15] : memref<5x16x16xf32, #tpu.memory_space<vmem>>, vector<1x16x16xf32>
    %15 = vector.shape_cast %14 : vector<1x16x16xf32> to vector<16x16xf32>
    %cst_16 = arith.constant dense<0.000000e+00> : vector<16x16xf32>
    %16 = tpu.matmul %15, %1, %cst_16 {dimension_numbers = #tpu.dot_dimension_numbers<[1], [0], [0], [1], [0, 0, 1, 1], [], []>} : vector<16x16xf32>, vector<16x16xf32>, vector<16x16xf32> -> vector<16x16xf32>
    %17 = arith.addf %13, %16 : vector<16x16xf32>
    %c15_i32 = arith.constant 15 : i32
    %18 = tpu.dynamic_rotate %1 by %c15_i32 dim 1 : vector<16x16xf32>, i32 -> vector<16x16xf32>
    %c3 = arith.constant 3 : index
    %c0_17 = arith.constant 0 : index
    %c0_18 = arith.constant 0 : index
    %19 = vector.load %arg4[%c3, %c0_17, %c0_18] : memref<5x16x16xf32, #tpu.memory_space<vmem>>, vector<1x16x16xf32>
    %20 = vector.shape_cast %19 : vector<1x16x16xf32> to vector<16x16xf32>
    %cst_19 = arith.constant dense<0.000000e+00> : vector<16x16xf32>
    %21 = tpu.matmul %20, %18, %cst_19 {dimension_numbers = #tpu.dot_dimension_numbers<[1], [0], [0], [1], [0, 0, 1, 1], [], []>} : vector<16x16xf32>, vector<16x16xf32>, vector<16x16xf32> -> vector<16x16xf32>
    %22 = arith.addf %17, %21 : vector<16x16xf32>
    %c14_i32 = arith.constant 14 : i32
    %23 = tpu.dynamic_rotate %1 by %c14_i32 dim 1 : vector<16x16xf32>, i32 -> vector<16x16xf32>
    %c4 = arith.constant 4 : index
    %c0_20 = arith.constant 0 : index
    %c0_21 = arith.constant 0 : index
    %24 = vector.load %arg4[%c4, %c0_20, %c0_21] : memref<5x16x16xf32, #tpu.memory_space<vmem>>, vector<1x16x16xf32>
    %25 = vector.shape_cast %24 : vector<1x16x16xf32> to vector<16x16xf32>
    %cst_22 = arith.constant dense<0.000000e+00> : vector<16x16xf32>
    %26 = tpu.matmul %25, %23, %cst_22 {dimension_numbers = #tpu.dot_dimension_numbers<[1], [0], [0], [1], [0, 0, 1, 1], [], []>} : vector<16x16xf32>, vector<16x16xf32>, vector<16x16xf32> -> vector<16x16xf32>
    %27 = arith.addf %22, %26 : vector<16x16xf32>
    %28 = vector.broadcast %2 : vector<16x1xf32> to vector<16x16xf32>
    %29 = arith.addf %27, %28 : vector<16x16xf32>
    %c0_23 = arith.constant 0 : index
    %c0_24 = arith.constant 0 : index
    %c0_25 = arith.constant 0 : index
    %30 = vector.load %arg6[%c0_23, %c0_24, %c0_25] : memref<1x1x16xf32, #tpu.memory_space<vmem>>, vector<1x1x16xf32>
    %31 = vector.shape_cast %30 : vector<1x1x16xf32> to vector<1x16xf32>
    %cst_26 = arith.constant dense<0.000000e+00> : vector<16xf32>
    %32 = vector.multi_reduction <add>, %29, %cst_26 [0] : vector<16x16xf32> to vector<16xf32>
    %33 = vector.shape_cast %32 : vector<16xf32> to vector<1x16xf32>
    %cst_27 = arith.constant 6.250000e-02 : f32
    %34 = vector.broadcast %cst_27 : f32 to vector<1x16xf32>
    %35 = arith.mulf %33, %34 : vector<1x16xf32>
    %36 = vector.broadcast %35 : vector<1x16xf32> to vector<16x16xf32>
    %37 = arith.subf %29, %36 : vector<16x16xf32>
    %38 = arith.mulf %37, %37 : vector<16x16xf32>
    %cst_28 = arith.constant dense<0.000000e+00> : vector<16xf32>
    %39 = vector.multi_reduction <add>, %38, %cst_28 [0] : vector<16x16xf32> to vector<16xf32>
    %40 = vector.shape_cast %39 : vector<16xf32> to vector<1x16xf32>
    %cst_29 = arith.constant 6.250000e-02 : f32
    %41 = vector.broadcast %cst_29 : f32 to vector<1x16xf32>
    %42 = arith.mulf %40, %41 : vector<1x16xf32>
    %cst_30 = arith.constant 9.99999974E-6 : f32
    %43 = vector.broadcast %cst_30 : f32 to vector<1x16xf32>
    %44 = arith.addf %42, %43 : vector<1x16xf32>
    %45 = math.rsqrt %44 : vector<1x16xf32>
    %46 = vector.broadcast %45 : vector<1x16xf32> to vector<16x16xf32>
    %47 = arith.mulf %37, %46 : vector<16x16xf32>
    %48 = vector.broadcast %3 : vector<16x1xf32> to vector<16x16xf32>
    %49 = arith.mulf %47, %48 : vector<16x16xf32>
    %50 = vector.broadcast %4 : vector<16x1xf32> to vector<16x16xf32>
    %51 = arith.addf %49, %50 : vector<16x16xf32>
    %cst_31 = arith.constant 5.000000e-01 : f32
    %52 = vector.broadcast %cst_31 : f32 to vector<16x16xf32>
    %53 = arith.mulf %52, %51 : vector<16x16xf32>
    %cst_32 = arith.constant 0.707106769 : f32
    %54 = vector.broadcast %cst_32 : f32 to vector<16x16xf32>
    %55 = arith.mulf %51, %54 : vector<16x16xf32>
    %56 = math.erf %55 : vector<16x16xf32>
    %cst_33 = arith.constant 1.000000e+00 : f32
    %57 = vector.broadcast %cst_33 : f32 to vector<16x16xf32>
    %58 = arith.addf %57, %56 : vector<16x16xf32>
    %59 = arith.mulf %53, %58 : vector<16x16xf32>
    %60 = vector.broadcast %31 : vector<1x16xf32> to vector<16x16xf32>
    %61 = arith.mulf %59, %60 : vector<16x16xf32>
    %c0_34 = arith.constant 0 : index
    %c0_35 = arith.constant 0 : index
    %c0_36 = arith.constant 0 : index
    %62 = vector.load %arg7[%c0_34, %c0_35, %c0_36] : memref<1x16x16xf32, #tpu.memory_space<vmem>>, vector<1x16x16xf32>
    %63 = vector.shape_cast %62 : vector<1x16x16xf32> to vector<16x16xf32>
    %64 = vector.shape_cast %61 : vector<16x16xf32> to vector<1x16x16xf32>
    tpu.vector_store %arg7[%c0_34, %c0_35, %c0_36], %64 {strides = array<i32>} : memref<1x16x16xf32, #tpu.memory_space<vmem>>, vector<1x16x16xf32>,
    %c0_37 = arith.constant 0 : index
    %c0_38 = arith.constant 0 : index
    %c0_39 = arith.constant 0 : index
    %c0_40 = arith.constant 0 : index
    %65 = vector.load %arg3[%c0_37, %c0_38, %c0_39, %c0_40] : memref<1x1x16x4xf32, #tpu.memory_space<vmem>>, vector<1x1x16x4xf32>
    %66 = vector.shape_cast %65 : vector<1x1x16x4xf32> to vector<16x4xf32>
    %67 = vector.extract_strided_slice %66 {offsets = [0, 0], sizes = [16, 2], strides = [1, 1]} : vector<16x4xf32> to vector<16x2xf32>
    %68 = vector.extract_strided_slice %1 {offsets = [0, 0], sizes = [16, 4], strides = [1, 1]} : vector<16x16xf32> to vector<16x4xf32>
    %69 = tpu.concatenate %67, %68 in 1 : vector<16x2xf32>, vector<16x4xf32> -> vector<16x6xf32>
    %70 = vector.extract_strided_slice %1 {offsets = [0, 12], sizes = [16, 4], strides = [1, 1]} : vector<16x16xf32> to vector<16x4xf32>
    %71 = vector.extract_strided_slice %66 {offsets = [0, 2], sizes = [16, 2], strides = [1, 1]} : vector<16x4xf32> to vector<16x2xf32>
    %72 = tpu.concatenate %70, %71 in 1 : vector<16x4xf32>, vector<16x2xf32> -> vector<16x6xf32>
    %73 = vector.extract_strided_slice %69 {offsets = [0, 0], sizes = [16, 2], strides = [1, 1]} : vector<16x6xf32> to vector<16x2xf32>
    %74 = vector.extract_strided_slice %72 {offsets = [0, 0], sizes = [16, 2], strides = [1, 1]} : vector<16x6xf32> to vector<16x2xf32>
    %75 = tpu.concatenate %73, %74 in 1 : vector<16x2xf32>, vector<16x2xf32> -> vector<16x4xf32>
    %c0_41 = arith.constant 0 : index
    %c0_42 = arith.constant 0 : index
    %c0_43 = arith.constant 0 : index
    %76 = vector.load %arg4[%c0_41, %c0_42, %c0_43] : memref<5x16x16xf32, #tpu.memory_space<vmem>>, vector<1x16x16xf32>
    %77 = vector.shape_cast %76 : vector<1x16x16xf32> to vector<16x16xf32>
    %cst_44 = arith.constant dense<0.000000e+00> : vector<16x4xf32>
    %78 = tpu.matmul %77, %75, %cst_44 {dimension_numbers = #tpu.dot_dimension_numbers<[1], [0], [0], [1], [0, 0, 1, 1], [], []>} : vector<16x16xf32>, vector<16x4xf32>, vector<16x4xf32> -> vector<16x4xf32>
    %79 = vector.extract_strided_slice %69 {offsets = [0, 1], sizes = [16, 2], strides = [1, 1]} : vector<16x6xf32> to vector<16x2xf32>
    %80 = vector.extract_strided_slice %72 {offsets = [0, 1], sizes = [16, 2], strides = [1, 1]} : vector<16x6xf32> to vector<16x2xf32>
    %81 = tpu.concatenate %79, %80 in 1 : vector<16x2xf32>, vector<16x2xf32> -> vector<16x4xf32>
    %c1_45 = arith.constant 1 : index
    %c0_46 = arith.constant 0 : index
    %c0_47 = arith.constant 0 : index
    %82 = vector.load %arg4[%c1_45, %c0_46, %c0_47] : memref<5x16x16xf32, #tpu.memory_space<vmem>>, vector<1x16x16xf32>
    %83 = vector.shape_cast %82 : vector<1x16x16xf32> to vector<16x16xf32>
    %cst_48 = arith.constant dense<0.000000e+00> : vector<16x4xf32>
    %84 = tpu.matmul %83, %81, %cst_48 {dimension_numbers = #tpu.dot_dimension_numbers<[1], [0], [0], [1], [0, 0, 1, 1], [], []>} : vector<16x16xf32>, vector<16x4xf32>, vector<16x4xf32> -> vector<16x4xf32>
    %85 = arith.addf %78, %84 : vector<16x4xf32>
    %86 = vector.extract_strided_slice %69 {offsets = [0, 2], sizes = [16, 2], strides = [1, 1]} : vector<16x6xf32> to vector<16x2xf32>
    %87 = vector.extract_strided_slice %72 {offsets = [0, 2], sizes = [16, 2], strides = [1, 1]} : vector<16x6xf32> to vector<16x2xf32>
    %88 = tpu.concatenate %86, %87 in 1 : vector<16x2xf32>, vector<16x2xf32> -> vector<16x4xf32>
    %c2_49 = arith.constant 2 : index
    %c0_50 = arith.constant 0 : index
    %c0_51 = arith.constant 0 : index
    %89 = vector.load %arg4[%c2_49, %c0_50, %c0_51] : memref<5x16x16xf32, #tpu.memory_space<vmem>>, vector<1x16x16xf32>
    %90 = vector.shape_cast %89 : vector<1x16x16xf32> to vector<16x16xf32>
    %cst_52 = arith.constant dense<0.000000e+00> : vector<16x4xf32>
    %91 = tpu.matmul %90, %88, %cst_52 {dimension_numbers = #tpu.dot_dimension_numbers<[1], [0], [0], [1], [0, 0, 1, 1], [], []>} : vector<16x16xf32>, vector<16x4xf32>, vector<16x4xf32> -> vector<16x4xf32>
    %92 = arith.addf %85, %91 : vector<16x4xf32>
    %93 = vector.extract_strided_slice %69 {offsets = [0, 3], sizes = [16, 2], strides = [1, 1]} : vector<16x6xf32> to vector<16x2xf32>
    %94 = vector.extract_strided_slice %72 {offsets = [0, 3], sizes = [16, 2], strides = [1, 1]} : vector<16x6xf32> to vector<16x2xf32>
    %95 = tpu.concatenate %93, %94 in 1 : vector<16x2xf32>, vector<16x2xf32> -> vector<16x4xf32>
    %c3_53 = arith.constant 3 : index
    %c0_54 = arith.constant 0 : index
    %c0_55 = arith.constant 0 : index
    %96 = vector.load %arg4[%c3_53, %c0_54, %c0_55] : memref<5x16x16xf32, #tpu.memory_space<vmem>>, vector<1x16x16xf32>
    %97 = vector.shape_cast %96 : vector<1x16x16xf32> to vector<16x16xf32>
    %cst_56 = arith.constant dense<0.000000e+00> : vector<16x4xf32>
    %98 = tpu.matmul %97, %95, %cst_56 {dimension_numbers = #tpu.dot_dimension_numbers<[1], [0], [0], [1], [0, 0, 1, 1], [], []>} : vector<16x16xf32>, vector<16x4xf32>, vector<16x4xf32> -> vector<16x4xf32>
    %99 = arith.addf %92, %98 : vector<16x4xf32>
    %100 = vector.extract_strided_slice %69 {offsets = [0, 4], sizes = [16, 2], strides = [1, 1]} : vector<16x6xf32> to vector<16x2xf32>
    %101 = vector.extract_strided_slice %72 {offsets = [0, 4], sizes = [16, 2], strides = [1, 1]} : vector<16x6xf32> to vector<16x2xf32>
    %102 = tpu.concatenate %100, %101 in 1 : vector<16x2xf32>, vector<16x2xf32> -> vector<16x4xf32>
    %c4_57 = arith.constant 4 : index
    %c0_58 = arith.constant 0 : index
    %c0_59 = arith.constant 0 : index
    %103 = vector.load %arg4[%c4_57, %c0_58, %c0_59] : memref<5x16x16xf32, #tpu.memory_space<vmem>>, vector<1x16x16xf32>
    %104 = vector.shape_cast %103 : vector<1x16x16xf32> to vector<16x16xf32>
    %cst_60 = arith.constant dense<0.000000e+00> : vector<16x4xf32>
    %105 = tpu.matmul %104, %102, %cst_60 {dimension_numbers = #tpu.dot_dimension_numbers<[1], [0], [0], [1], [0, 0, 1, 1], [], []>} : vector<16x16xf32>, vector<16x4xf32>, vector<16x4xf32> -> vector<16x4xf32>
    %106 = arith.addf %99, %105 : vector<16x4xf32>
    %107 = vector.broadcast %2 : vector<16x1xf32> to vector<16x4xf32>
    %108 = arith.addf %106, %107 : vector<16x4xf32>
    %109 = vector.extract_strided_slice %31 {offsets = [0, 0], sizes = [1, 2], strides = [1, 1]} : vector<1x16xf32> to vector<1x2xf32>
    %110 = vector.extract_strided_slice %31 {offsets = [0, 14], sizes = [1, 2], strides = [1, 1]} : vector<1x16xf32> to vector<1x2xf32>
    %111 = tpu.concatenate %109, %110 in 1 : vector<1x2xf32>, vector<1x2xf32> -> vector<1x4xf32>
    %cst_61 = arith.constant dense<0.000000e+00> : vector<4xf32>
    %112 = vector.multi_reduction <add>, %108, %cst_61 [0] : vector<16x4xf32> to vector<4xf32>
    %113 = vector.shape_cast %112 : vector<4xf32> to vector<1x4xf32>
    %cst_62 = arith.constant 6.250000e-02 : f32
    %114 = vector.broadcast %cst_62 : f32 to vector<1x4xf32>
    %115 = arith.mulf %113, %114 : vector<1x4xf32>
    %116 = vector.broadcast %115 : vector<1x4xf32> to vector<16x4xf32>
    %117 = arith.subf %108, %116 : vector<16x4xf32>
    %118 = arith.mulf %117, %117 : vector<16x4xf32>
    %cst_63 = arith.constant dense<0.000000e+00> : vector<4xf32>
    %119 = vector.multi_reduction <add>, %118, %cst_63 [0] : vector<16x4xf32> to vector<4xf32>
    %120 = vector.shape_cast %119 : vector<4xf32> to vector<1x4xf32>
    %cst_64 = arith.constant 6.250000e-02 : f32
    %121 = vector.broadcast %cst_64 : f32 to vector<1x4xf32>
    %122 = arith.mulf %120, %121 : vector<1x4xf32>
    %cst_65 = arith.constant 9.99999974E-6 : f32
    %123 = vector.broadcast %cst_65 : f32 to vector<1x4xf32>
    %124 = arith.addf %122, %123 : vector<1x4xf32>
    %125 = math.rsqrt %124 : vector<1x4xf32>
    %126 = vector.broadcast %125 : vector<1x4xf32> to vector<16x4xf32>
    %127 = arith.mulf %117, %126 : vector<16x4xf32>
    %128 = vector.broadcast %3 : vector<16x1xf32> to vector<16x4xf32>
    %129 = arith.mulf %127, %128 : vector<16x4xf32>
    %130 = vector.broadcast %4 : vector<16x1xf32> to vector<16x4xf32>
    %131 = arith.addf %129, %130 : vector<16x4xf32>
    %cst_66 = arith.constant 5.000000e-01 : f32
    %132 = vector.broadcast %cst_66 : f32 to vector<16x4xf32>
    %133 = arith.mulf %132, %131 : vector<16x4xf32>
    %cst_67 = arith.constant 0.707106769 : f32
    %134 = vector.broadcast %cst_67 : f32 to vector<16x4xf32>
    %135 = arith.mulf %131, %134 : vector<16x4xf32>
    %136 = math.erf %135 : vector<16x4xf32>
    %cst_68 = arith.constant 1.000000e+00 : f32
    %137 = vector.broadcast %cst_68 : f32 to vector<16x4xf32>
    %138 = arith.addf %137, %136 : vector<16x4xf32>
    %139 = arith.mulf %133, %138 : vector<16x4xf32>
    %140 = vector.broadcast %111 : vector<1x4xf32> to vector<16x4xf32>
    %141 = arith.mulf %139, %140 : vector<16x4xf32>
    %142 = vector.extract_strided_slice %141 {offsets = [0, 0], sizes = [16, 2], strides = [1, 1]} : vector<16x4xf32> to vector<16x2xf32>
    %c0_69 = arith.constant 0 : index
    %c0_70 = arith.constant 0 : index
    %c0_71 = arith.constant 0 : index
    %143 = vector.load %arg7[%c0_69, %c0_70, %c0_71] : memref<1x16x16xf32, #tpu.memory_space<vmem>>, vector<1x16x2xf32>
    %144 = vector.shape_cast %143 : vector<1x16x2xf32> to vector<16x2xf32>
    %145 = vector.shape_cast %142 : vector<16x2xf32> to vector<1x16x2xf32>
    tpu.vector_store %arg7[%c0_69, %c0_70, %c0_71], %145 {strides = array<i32>} : memref<1x16x16xf32, #tpu.memory_space<vmem>>, vector<1x16x2xf32>,
    %146 = vector.extract_strided_slice %141 {offsets = [0, 2], sizes = [16, 2], strides = [1, 1]} : vector<16x4xf32> to vector<16x2xf32>
    %c0_72 = arith.constant 0 : index
    %c0_73 = arith.constant 0 : index
    %c14 = arith.constant 14 : index
    %147 = vector.load %arg7[%c0_72, %c0_73, %c14] : memref<1x16x16xf32, #tpu.memory_space<vmem>>, vector<1x16x2xf32>
    %148 = vector.shape_cast %147 : vector<1x16x2xf32> to vector<16x2xf32>
    %149 = vector.shape_cast %146 : vector<16x2xf32> to vector<1x16x2xf32>
    tpu.vector_store %arg7[%c0_72, %c0_73, %c14], %149 {strides = array<i32>} : memref<1x16x16xf32, #tpu.memory_space<vmem>>, vector<1x16x2xf32>,
    return
  }
  func.func @transform_0(%arg0: i32, %arg1: i32) -> (i32, i32, i32) {
    %c0_i32 = arith.constant 0 : i32
    %c0_i32_0 = arith.constant 0 : i32
    return %arg0, %c0_i32, %arg1 : i32, i32, i32
  }
  func.func @transform_1(%arg0: i32, %arg1: i32) -> (i32, i32, i32, i32) {
    %c0_i32 = arith.constant 0 : i32
    %c0_i32_0 = arith.constant 0 : i32
    %c0_i32_1 = arith.constant 0 : i32
    return %arg0, %arg1, %c0_i32, %c0_i32_0 : i32, i32, i32, i32
  }
  func.func @transform_2(%arg0: i32, %arg1: i32) -> (i32, i32, i32) {
    %c0_i32 = arith.constant 0 : i32
    %c0_i32_0 = arith.constant 0 : i32
    %c0_i32_1 = arith.constant 0 : i32
    %c0_i32_2 = arith.constant 0 : i32
    return %c0_i32, %c0_i32_0, %c0_i32_1 : i32, i32, i32
  }
  func.func @transform_3(%arg0: i32, %arg1: i32) -> (i32, i32) {
    %c0_i32 = arith.constant 0 : i32
    %c0_i32_0 = arith.constant 0 : i32
    %c0_i32_1 = arith.constant 0 : i32
    return %c0_i32, %c0_i32_0 : i32, i32
  }
  func.func @transform_4(%arg0: i32, %arg1: i32) -> (i32, i32, i32) {
    %c0_i32 = arith.constant 0 : i32
    %c0_i32_0 = arith.constant 0 : i32
    return %arg0, %c0_i32, %arg1 : i32, i32, i32
  }
  func.func @transform_5(%arg0: i32, %arg1: i32) -> (i32, i32, i32) {
    %c0_i32 = arith.constant 0 : i32
    %c0_i32_0 = arith.constant 0 : i32
    return %arg0, %c0_i32, %arg1 : i32, i32, i32
  }
}

</mosaic_0001>

<bundles_post_ra>
// kernel: tpu_custom_call.1
= control target key start
LH: loop header
LB: loop body
LE: loop exit
PB: predicated region body
PF: predicated region fallthrough
CT: control target
= control target key end

     0   :  { %10 = vsyncpa [#allocation3], 0  ;;  %s2443_s0 = inlined_call_operand.vmem [shape: f32[2,16,16], index: 0, kind: input, shape index: {}]   ;;  %s2444_s1 = inlined_call_operand.vmem [shape: f32[2,1,16,4], index: 1, kind: input, shape index: {}]   ;;  %s2445_s2 = inlined_call_operand.hbm [shape: f32[5,16,16], index: 2, kind: input, shape index: {}]   ;;  %s2446_s3 = inlined_call_operand.vmem [shape: f32[16,3], index: 3, kind: input, shape index: {}]   ;;  %s2447_s4 = inlined_call_operand.vmem [shape: f32[2,1,16], index: 4, kind: input, shape index: {}]   ;;  %s2448_s5 = inlined_call_operand.hbm [shape: f32[2,16,16], index: 5, kind: output, shape index: {}]  }
   0x1   :  { %11 = vsyncpa [#allocation4], 0 }
   0x2   :  { %13 = vsyncpa [#allocation4 + $0x1], 0  ;;  %s2144_s18 = smov 0   ;;  %s2146_s19 = smov 0  }
   0x3   :  { %s2148_s20 = smov 0   ;;  %s2150_s21 = smov 0  }
   0x4   :  { %s2152_s22 = smov 0   ;;  %s2154_s23 = smov 0  }
   0x5 LB: > { %s1590_s24 = sadd.s32 4294967295, %s2092_s23   ;;  %s1591_s25 = sadd.s32 4294967294, %s2092_s23   ;;  %s2092_s23 = sphi %s2154_s23, %s19_s23   ;;  %s2088_s22 = sphi %s2152_s22, %s2466_s22   ;;  %s2084_s21 = sphi %s2150_s21, %s2465_s21   ;;  %s2080_s20 = sphi %s2148_s20, %s2464_s20   ;;  %s2076_s19 = sphi %s2146_s19, %s2463_s19   ;;  %s2072_s18 = sphi %s2144_s18, %s2462_s18  }
   0x6   : > { %s31_s26 = sadd.s32 1, %s2088_s22  ;;  %s166_s27 = sadd.s32 1, %s2080_s20 }
   0x7   : > { %p33_p0 = scmp.ge.s32.totalorder %s31_s26, 2  ;;  %p176_p1 = scmp.ne.s32.totalorder %s2080_s20, %s2076_s19 }
   0x8   : > { %p177_p2 = scmp.eq.s32.totalorder %s1590_s24, 1  ;;  %p182_p3 = scmp.ne.s32.totalorder %s2076_s19, %s2072_s18 }
   0x9   : > { %s2468_s26 = smov (%p33_p0, %s31_s26), 0  ;;  %p183_p5 = scmp.eq.s32.totalorder %s1591_s25, 1 }
   0xa   : > { %p2184_p4 = por %p177_p2, %p176_p1  ;;  %s161_s29 = ssub.s32 %s2088_s22, %s2468_s26 }
   0xb   : > { %p1592_p6 = scmp.ge.s32.totalorder %s2092_s23, 1  ;;  %p164_p7 = scmp.eq.s32.totalorder %s161_s29, 0 }
   0xc   : > { %s2453_s28 = scalar_select %p2184_p4, 1, 0 }
   0xd   : > { %p2191_p8 = por %p183_p5, %p182_p3  ;;  %p190_p9 = scmp.lt.s32.totalorder %s2092_s23, 3 }
   0xe   : > { %s2197_s6 = scalar_select %p164_p7, %s2080_s20, %s166_s27  }
   0xf   : > { %s2454_s30 = scalar_select %p2191_p8, 1, 0 }
  0x10   : > { %p2199_p10 = pnand %p1592_p6, %p190_p9  ;;  %p2203_p11 = scmp.eq.s32.totalorder %s1590_s24, 0 }
  0x11   : > { %s2094_s9 = smov [#allocation2]   ;;  %s1982_s14 = scalar_lea.hbm %s2445_s2, 1280 }
  0x12   : > { %s2455_s7 = scalar_select %p2199_p10, 1, 0 }
  0x13   : > { %s2456_s8 = scalar_select %p2203_p11, 1, 0 }
  0x14   : > { %p1802_p12 = pneg %p2199_p10  ;;  %s202_s10 = sshll.u32 %s2094_s9, 4  ;;  %s203_s10 = int_to_ptr.vmem [resolvable:$true] %s202_s10 }
  0x15   : > { %p1983_p0 = scmp.ne.s32.totalorder %s2445_s2, %s1982_s14  ;;  %p1989_p5 = scmp.lt.u32.totalorder %s1982_s14, %s2445_s2 }
  0x16   : > { %p2211_p13 = pnand %p2203_p11, %p1802_p12 }
  0x18   : > { %p1984_p1 = pneg %p2211_p13 }
  0x1a   : > { %p1985_p2 = pnand %p1984_p1, %p1983_p0 }
  0x1c   : > { %p1986_p3 = pneg %p1985_p2 }
  0x1e   : > { %p1991_p6 = pnand %p1989_p5, %p1986_p3 }
  0x20   : > { %1994 = shalt.err (!%p1991_p6)
}
  0x21   : > { %s1995_s25 = scalar_lea.vmem %s203_s10, 1280  ;;  %p2003_p8 = scmp.lt.s32.totalorder %s203_s10, %s203_s10 }
  0x22   : > { %p1996_p7 = scmp.ne.s32.totalorder %s203_s10, %s1995_s25  ;;  %p2004_p4 = scmp.lt.s32.totalorder %s1995_s25, %s1995_s25 }
  0x24   : > { %p1998_p9 = pnand %p1996_p7, %p1984_p1  ;;  %p2005_p11 = por %p2004_p4, %p2003_p8 }
  0x26   : > { %p1999_p12 = pneg %p1998_p9 }
  0x28   : > { %p2006_p10 = pnand %p2005_p11, %p1999_p12 }
  0x2a   : > { %2009 = shalt.err (!%p2006_p10)
}
  0x2b   : > { %s2095_s27 = smov 128   ;;  %s2096_s29 = smov 8  }
  0x2c   : > { %1805 = dma.hbm_to_vmem [thread:$0]  (!%p2211_p13), %s2445_s2, 1280, %s203_s10, [#allocation3], %s2095_s27, %s2095_s27, %s2096_s29  }
  0x2d   : > { %p2458_p0 = scmp.ne.s32.totalorder %s2455_s7, 0 }
  0x2e   : > { %p2459_p2 = scmp.ne.s32.totalorder (!%p2458_p0), %s2456_s8, 0 }
  0x2f   : > { %253 = sbr.rel (%p2458_p0) target bundleno = 768 (0x300), region = 40 }
  0x36   : > { %2063 = dma.done.wait (%p2459_p2), [#allocation3], 1280  }
  0x37   : > { %2065 = vsyncadd (%p2459_p2), [#allocation3], 4294966016  ;;  %p299_p4 = scmp.lt.s32.totalorder %s2084_s21, 1  ;;  %s2097_s8 = smov 116   ;;  %vm326_vm0 = vcmask 1047680   ;;  %vm899_vm1 = vcmask 31744  }
  0x38   : > { %s2098_s24 = smov 16   ;;  %s2099_s25 = smov 2   ;;  %vm882_vm2 = vcmask 15360   ;;  %v930_v21 = vld [vmem:[#allocation2 + $0x10] sm:$0xff]  ;;  %vm352_vm3 = vcmask 130048   ;;  %v2105_v31 = vmov 0  }
  0x39   : > { %s2239_s13 = scalar_select %p299_p4, %s2084_s21, 1  ;;  %1709 = vmatprep.mubr.msk.f32.mxu1 %vm352_vm3, %v930_v21  ;;  %1674 = vmatprep.mubr.msk.f32.mxu0 %vm352_vm3, %v930_v21  ;;  %v2280_v50 = vld [vmem:[#allocation2 + $0x18] sm:$0xff]  ;;  %v2286_v58 = vld [vmem:[#allocation2] sm:$0xff]  ;;  %v325_v59 = vld [vmem:[%s2446_s3 + $0x8] sm:$0xff]  ;;  %v2108_v21 = vmov 1   ;;  %vm1449_vm4 = vcmask 130160  }
  0x3a   : > { %s2100_s27 = smov 127   ;;  %s2101_s29 = smov 1   ;;  %1966 = vset.pattern.permute.xlu0 %v2105_v31  ;;  %1965 = vset.pattern.permute.xlu1 %v2105_v31  ;;  %v324_v61 = vld [vmem:[%s2446_s3] sm:$0xff] }
  0x3b   : > { %s1627_s11 = sshll.u32 %s2239_s13, 4  ;;  %s2102_s9 = smov 126  }
  0x3c   : > { %s306_s10 = scalar_lea.vmem %s2443_s0, %s1627_s11  ;;  %s315_s17 = scalar_lea.vmem %s2444_s1, %s1627_s11 }
  0x3d   : > { %v2248_v0 = vld [vmem:[%s306_s10] sm:$0xff]  ;;  %v2250_v1 = vld [vmem:[%s306_s10 + $0x8] sm:$0xff]  ;;  %s2103_s12 = smov 125   ;;  %s2104_s11 = smov 124  }
  0x3e   : > { %v872_v2 = vld [vmem:[%s315_s17] sm:$0xff]  ;;  %v1890_v3 = vpack.i.bf16 %v2250_v1, %v2248_v0  ;;  %v873_v4 = vld [vmem:[%s315_s17 + $0x8] sm:$0xff]  ;;  %s2106_s14 = smov 114   ;;  %s2107_s15 = smov 113  }
  0x3f   : > { %v1895_v5 = vpack.i.bf16 %v873_v4, %v872_v2  ;;  %p2460_p10 = scmp.ne.s32.totalorder %s2453_s28, 0  ;;  %s2111_s7 = smov [#allocation5]  }
  0x40   : > { %1891 = vrot.lane.b32.xlu1 %v1890_v3, %s2097_s8  ;;  %1881 = vrot.lane.b32.xlu0 %v1890_v3, %s2098_s24  ;;  %s2014_s17 = sshll.u32 %s2111_s7, 4  ;;  %s2015_s17 = int_to_ptr.vmem [resolvable:$false] %s2014_s17 }
  0x44   : > { %1896 = vrot.lane.b32.xlu1 %v1895_v5, %s2099_s25  ;;  %1886 = vrot.lane.b32.xlu0 %v1890_v3, %s2099_s25 }
  0xb2   : > { %v1892_v6 = vpop.permute.xlu1 %1891  ;;  %v1882_v7 = vpop.permute.xlu0 %1881 }
  0xb3   : > { %v1884_v8 = vunpack.i.h.bf16 %v1882_v7  ;;  %v1883_v9 = vunpack.i.l.bf16 %v1882_v7  ;;  %v1894_v12 = vunpack.i.h.bf16 %v1892_v6  ;;  %v1893_v13 = vunpack.i.l.bf16 %v1892_v6 }
  0xb5   : > { %v329_v10 = vsel %vm326_vm0, %v1883_v9, %v2248_v0  ;;  %v332_v11 = vsel %vm326_vm0, %v1884_v8, %v2250_v1  ;;  %v2302_v9 = vld [vmem:[#allocation2 + $0x20] sm:$0xff] }
  0xb6   : > { %v1897_v14 = vpop.permute.xlu1 %1896  ;;  %v1887_v15 = vpop.permute.xlu0 %1886  ;;  %v1900_v16 = vpack.i.bf16 %v332_v11, %v329_v10 }
  0xb7   : > { %v1899_v17 = vunpack.i.h.bf16 %v1897_v14  ;;  %v1898_v18 = vunpack.i.l.bf16 %v1897_v14  ;;  %v1889_v19 = vunpack.i.h.bf16 %v1887_v15  ;;  %v1888_v20 = vunpack.i.l.bf16 %v1887_v15  ;;  %v1103_v15 = vld [vmem:[#allocation2 + $0x28] sm:$0xff] }
  0xb8   : > { %1901 = vrot.lane.b32.xlu0 %v1900_v16, %s2098_s24  ;;  %s2016_s24 = scalar_lea.vmem %s2015_s17, 512 }
  0xb9   : > { %v900_v22 = vsel %vm899_vm1, %v1893_v13, %v1898_v18  ;;  %v901_v23 = vsel %vm899_vm1, %v1894_v12, %v1899_v17  ;;  %v884_v24 = vsel %vm882_vm2, %v873_v4, %v1889_v19  ;;  %v883_v25 = vsel %vm882_vm2, %v872_v2, %v1888_v20  ;;  %v2298_v4 = vld [vmem:[#allocation2 + $0x8] sm:$0xff]  ;;  %v1201_v18 = vld [vmem:[#allocation2 + $0x30] sm:$0xff] }
  0xba   : > { %v1905_v26 = vpack.i.bf16 %v884_v24, %v883_v25  ;;  %v1910_v27 = vpack.i.bf16 %v901_v23, %v900_v22  ;;  %v863_v20 = vlaneseq }
  0xbc   : > { %1906 = vrot.lane.b32.xlu1 %v1905_v26, %s2100_s27  ;;  %1911 = vrot.lane.b32.xlu0 %v1910_v27, %s2101_s29 }
  0xc0   : > { %1916 = vrot.lane.b32.xlu1 %v1910_v27, %s2099_s25  ;;  %1921 = vrot.lane.b32.xlu0 %v1905_v26, %s2102_s9 }
  0xc4   : > { %1926 = vrot.lane.b32.xlu1 %v1905_v26, %s2103_s12  ;;  %1931 = vrot.lane.b32.xlu0 %v1910_v27, %s2100_s27 }
  0xc8   : > { %1936 = vrot.lane.b32.xlu1 %v1905_v26, %s2104_s11  ;;  %1941 = vrot.lane.b32.xlu0 %v1910_v27, %s2102_s9 }
 0x12a   : > { %v1902_v28 = vpop.permute.xlu0 %1901 }
 0x12b   : > { %v1904_v29 = vunpack.i.h.bf16 %v1902_v28  ;;  %v1903_v30 = vunpack.i.l.bf16 %v1902_v28  ;;  %v1301_v28 = vld [vmem:[#allocation2 + $0x48] sm:$0xff] }
 0x12d   : > { %v338_v32 = vsel %vm326_vm0, %v1904_v29, %v2250_v1  ;;  %v337_v33 = vsel %vm326_vm0, %v1903_v30, %v2248_v0 }
 0x12e   : > { %v1907_v34 = vpop.permute.xlu1 %1906  ;;  %v1912_v35 = vpop.permute.xlu0 %1911  ;;  %v1950_v36 = vpack.i.bf16 %v338_v32, %v337_v33 }
 0x12f   : > { %v1909_v37 = vunpack.i.h.bf16 %v1907_v34  ;;  %v1908_v38 = vunpack.i.l.bf16 %v1907_v34  ;;  %v1914_v39 = vunpack.i.h.bf16 %v1912_v35  ;;  %v1913_v40 = vunpack.i.l.bf16 %v1912_v35 }
 0x130   : > { %1951 = vrot.lane.b32.xlu0 %v1950_v36, %s2106_s14  ;;  %1946 = vrot.lane.b32.xlu1 %v1950_v36, %s2107_s15 }
 0x131   : > { %v928_v41 = vsel %vm882_vm2, %v1908_v38, %v1913_v40  ;;  %v929_v42 = vsel %vm882_vm2, %v1909_v37, %v1914_v39  ;;  %v1748_v38 = vpack.c.bf16 %v2250_v1, %v2248_v0 }
 0x132   : > { %v1917_v43 = vpop.permute.xlu1 %1916  ;;  %v1922_v44 = vpop.permute.xlu0 %1921  ;;  %v1760_v45 = vpack.c.bf16 %v929_v42, %v928_v41 }
 0x133   : > { %v1919_v46 = vunpack.i.h.bf16 %v1917_v43  ;;  %v1918_v47 = vunpack.i.l.bf16 %v1917_v43  ;;  %v1924_v48 = vunpack.i.h.bf16 %v1922_v44  ;;  %v1923_v49 = vunpack.i.l.bf16 %v1922_v44 }
 0x134   : > { %1761 = vmatprep.subr.bf16.mxu1 %v1760_v45  ;;  %1961 = vrot.lane.b32.xlu0 %v1950_v36, %s2102_s9  ;;  %s1629_s9 = sshll.u32 %s2084_s21, 8 }
 0x135   : > { %1956 = vrot.lane.b32.xlu1 %v1950_v36, %s2100_s27  ;;  %1763 = vmatpush3.bf16.msra.mxu1 %v1760_v45  ;;  %v910_v51 = vsel %vm882_vm2, %v883_v25, %v1918_v47  ;;  %v911_v52 = vsel %vm882_vm2, %v884_v24, %v1919_v46  ;;  %v1100_v53 = vsel %vm882_vm2, %v1923_v49, %v900_v22  ;;  %v2109_v22 = vmov 2   ;;  %v1300_v24 = vld [vmem:[#allocation2 + $0x40] sm:$0xff]  ;;  %s321_s27 = scalar_lea.vmem %s2447_s4, %s2239_s13  ;;  %s2110_s13 = smov 12  }
 0x136   : > { %v1927_v54 = vpop.permute.xlu1 %1926  ;;  %v1932_v55 = vpop.permute.xlu0 %1931  ;;  %v1764_v56 = vpack.c.bf16 %v911_v52, %v910_v51  ;;  %v1101_v57 = vsel %vm882_vm2, %v1924_v48, %v901_v23  ;;  %v1202_v23 = vld [vmem:[#allocation2 + $0x38] sm:$0xff]  ;;  %v2312_v25 = vshrl.u32 %v863_v20, 7  ;;  %v2321_v27 = vld [vmem:[%s321_s27] sm:$0x1]  ;;  %s2388_s10 = scalar_lea.hbm %s2448_s5, %s1629_s9 }
 0x137   : > { %v1768_v60 = vpack.c.bf16 %v1101_v57, %v1100_v53  ;;  %v1929_v62 = vunpack.i.h.bf16 %v1927_v54  ;;  %v1928_v63 = vunpack.i.l.bf16 %v1927_v54  ;;  %v1934_v2 = vunpack.i.h.bf16 %v1932_v55 }
 0x138   : > { %1710 = vmatmul.mubr.msk.f32.vlgmr.msra.gmra.mrb[0].mxu1 %vm352_vm3, %v2280_v50  ;;  %1765 = vmatprep.subr.bf16.mxu1 %v1764_v56  ;;  %v1933_v3 = vunpack.i.l.bf16 %v1932_v55  ;;  %v865_v26 = vsub.s32 0, %v2312_v25 }
 0x139   : > { %1767 = vmatpush3.bf16.msra.mxu1 %v1764_v56  ;;  %1716 = vmatprep.mubr.msk.f32.mxu1 %vm352_vm3, %v2286_v58  ;;  %v1200_v6 = vsel %vm882_vm2, %v1929_v62, %v1934_v2 }
 0x13a   : > { %1769 = vmatprep.subr.bf16.mxu1 %v1768_v60  ;;  %798 = vperm.xlu0 %1966, %v325_v59   ;;  %v1199_v5 = vsel %vm882_vm2, %v1928_v63, %v1933_v3  ;;  %v1937_v7 = vpop.permute.xlu1 %1936  ;;  %v1942_v8 = vpop.permute.xlu0 %1941  ;;  %v2326_v29 = vrot.slane %v2321_v27, %v865_v26 }
 0x13b   : > { %793 = vperm.xlu1 %1965, %v324_v61   ;;  %v1772_v10 = vpack.c.bf16 %v1200_v6, %v1199_v5  ;;  %v1939_v11 = vunpack.i.h.bf16 %v1937_v7  ;;  %v1938_v12 = vunpack.i.l.bf16 %v1937_v7  ;;  %v1944_v13 = vunpack.i.h.bf16 %v1942_v8 }
 0x13c   : > { %v1943_v14 = vunpack.i.l.bf16 %v1942_v8 }
 0x13d   : > { %v1299_v17 = vsel %vm882_vm2, %v1939_v11, %v1944_v13 }
 0x13e   : > { %v1298_v16 = vsel %vm882_vm2, %v1938_v12, %v1943_v14  ;;  %1968 = vset.pattern.permute.xlu0 %v2109_v22 }
 0x13f   : > { %v1776_v19 = vpack.c.bf16 %v1299_v17, %v1298_v16  ;;  %1967 = vset.pattern.permute.xlu1 %v2108_v21  ;;  %843 = vperm.xlu0 %1968, %v324_v61  }
 0x140   : > { %1717 = vmatmul.mubr.msk.f32.vlgmr.msra.gmra.mrb[0].mxu1 %vm352_vm3, %v2298_v4  ;;  %833 = vperm.xlu1 %1967, %v324_v61  }
 0x141   : > { %1771 = vmatpush3.bf16.msra.mxu1 %v1768_v60  ;;  %1723 = vmatprep.mubr.msk.f32.mxu1 %vm352_vm3, %v2302_v9 }
 0x142   : > { %1773 = vmatprep.subr.bf16.mxu1 %v1772_v10 }
 0x144   : > { %837 = vperm.xlu1 %1967, %v325_v59  }
 0x148   : > { %1724 = vmatmul.mubr.msk.f32.vlgmr.msra.gmra.mrb[0].mxu1 %vm352_vm3, %v1103_v15  ;;  %1969 = vset.pattern.permute.xlu1 %v2109_v22 }
 0x149   : > { %1775 = vmatpush3.bf16.msra.mxu1 %v1772_v10  ;;  %1730 = vmatprep.mubr.msk.f32.mxu1 %vm352_vm3, %v1201_v18 }
 0x14a   : > { %1777 = vmatprep.subr.bf16.mxu1 %v1776_v19  ;;  %847 = vperm.xlu1 %1969, %v325_v59  }
 0x14e   : > { %1387 = vrot.lane.b32.xlu1 %v2326_v29, %s2097_s8  ;;  %s296_s8 = sand.u32 1, %s2076_s19  }
 0x14f   : > { %s1597_s29 = sshll.u32 %s296_s8, 4  ;;  %s2397_s21 = scalar_lea.sflag [#allocation4], %s296_s8 }
 0x150   : > { %1731 = vmatmul.mubr.msk.f32.vlgmr.msra.gmra.mrb[0].mxu1 %vm352_vm3, %v1202_v23  ;;  %s298_s12 = scalar_lea.vmem [#allocation5], %s1597_s29 }
 0x151   : > { %1779 = vmatpush3.bf16.msra.mxu1 %v1776_v19  ;;  %1737 = vmatprep.mubr.msk.f32.mxu1 %vm352_vm3, %v1300_v24  ;;  %s1467_s11 = sshll.u32 %s298_s12, 4  ;;  %s2390_s11 = int_to_ptr.vmem [resolvable:$true] %s1467_s11 }
 0x152   : > { %s2010_s16 = scalar_lea.vmem %s2390_s11, 256  ;;  %p2017_p1 = scmp.lt.s32.totalorder %s2390_s11, %s2015_s17 }
 0x153   : > { %p2011_p8 = scmp.ne.s32.totalorder %s2390_s11, %s2010_s16  ;;  %p2018_p3 = scmp.lt.s32.totalorder %s2016_s24, %s2010_s16 }
 0x155   : > { %p2012_p11 = pnand %p2011_p8, %p2460_p10  ;;  %p2019_p5 = por %p2018_p3, %p2017_p1 }
 0x157   : > { %p2013_p13 = pneg %p2012_p11 }
 0x158   : > { %1738 = vmatmul.mubr.msk.f32.vlgmr.msra.gmra.mrb[0].mxu1 %vm352_vm3, %v1301_v28 }
 0x159   : > { %p2020_p6 = pnand %p2019_p5, %p2013_p13 }
 0x1a2   : > { %v1952_v30 = vpop.permute.xlu0 %1951  ;;  %v1947_v31 = vpop.permute.xlu1 %1946 }
 0x1a3   : > { %v1954_v32 = vunpack.i.h.bf16 %v1952_v30  ;;  %v1953_v33 = vunpack.i.l.bf16 %v1952_v30  ;;  %v1949_v34 = vunpack.i.h.bf16 %v1947_v31  ;;  %v1948_v35 = vunpack.i.l.bf16 %v1947_v31 }
 0x1a5   : > { %v1740_v36 = vpack.c.bf16 %v1949_v34, %v1948_v35  ;;  %v1744_v37 = vpack.c.bf16 %v1954_v32, %v1953_v33 }
 0x1a6   : > { %v1962_v43 = vpop.permute.xlu0 %1961 }
 0x1a7   : > { %1741 = vmatprep.subr.bf16.mxu0 %v1740_v36  ;;  %v1957_v39 = vpop.permute.xlu1 %1956  ;;  %v1964_v0 = vunpack.i.h.bf16 %v1962_v43  ;;  %v1963_v1 = vunpack.i.l.bf16 %v1962_v43 }
 0x1a8   : > { %1743 = vmatpush3.bf16.msra.mxu0 %v1740_v36  ;;  %v1959_v40 = vunpack.i.h.bf16 %v1957_v39  ;;  %v1958_v41 = vunpack.i.l.bf16 %v1957_v39 }
 0x1a9   : > { %1745 = vmatprep.subr.bf16.mxu0 %v1744_v37  ;;  %v1756_v44 = vpack.c.bf16 %v1964_v0, %v1963_v1 }
 0x1aa   : > { %v1752_v42 = vpack.c.bf16 %v1959_v40, %v1958_v41 }
 0x1ab   : > { %1675 = vmatmul.mubr.msk.f32.vlgmr.msra.gmra.mrb[0].mxu0 %vm352_vm3, %v2280_v50 }
 0x1ac   : > { %1747 = vmatpush3.bf16.msra.mxu0 %v1744_v37  ;;  %1681 = vmatprep.mubr.msk.f32.mxu0 %vm352_vm3, %v2286_v58 }
 0x1ad   : > { %1749 = vmatprep.subr.bf16.mxu0 %v1748_v38 }
 0x1b3   : > { %1682 = vmatmul.mubr.msk.f32.vlgmr.msra.gmra.mrb[0].mxu0 %vm352_vm3, %v2298_v4 }
 0x1b4   : > { %1751 = vmatpush3.bf16.msra.mxu0 %v1748_v38  ;;  %1688 = vmatprep.mubr.msk.f32.mxu0 %vm352_vm3, %v2302_v9 }
 0x1b5   : > { %1753 = vmatprep.subr.bf16.mxu0 %v1752_v42 }
 0x1b9   : > { %v2346_v45 = vpop.permute.xlu0 %798 }
 0x1ba   : > { %v2348_v46 = vpop.permute.xlu1 %793 }
 0x1bb   : > { %1689 = vmatmul.mubr.msk.f32.vlgmr.msra.gmra.mrb[0].mxu0 %vm352_vm3, %v1103_v15 }
 0x1bc   : > { %1755 = vmatpush3.bf16.msra.mxu0 %v1752_v42  ;;  %1695 = vmatprep.mubr.msk.f32.mxu0 %vm352_vm3, %v1201_v18 }
 0x1bd   : > { %1757 = vmatprep.subr.bf16.mxu0 %v1756_v44 }
 0x1be   : > { %v844_v19 = vpop.permute.xlu0 %843 }
 0x1bf   : > { %v2356_v14 = vpop.permute.xlu1 %833 }
 0x1c3   : > { %1696 = vmatmul.mubr.msk.f32.vlgmr.msra.gmra.mrb[0].mxu0 %vm352_vm3, %v1202_v23  ;;  %v2358_v15 = vpop.permute.xlu1 %837 }
 0x1c4   : > { %1759 = vmatpush3.bf16.msra.mxu0 %v1756_v44  ;;  %1702 = vmatprep.mubr.msk.f32.mxu0 %vm352_vm3, %v1300_v24 }
 0x1c9   : > { %v848_v20 = vpop.permute.xlu1 %847 }
 0x1cb   : > { %1703 = vmatmul.mubr.msk.f32.vlgmr.msra.gmra.mrb[0].mxu0 %vm352_vm3, %v1301_v28 }
 0x1cd   : > { %v1388_v31 = vpop.permute.xlu1 %1387 }
 0x1ce   : > { %v1390_v32 = vsel %vm882_vm2, %v2321_v27, %v1388_v31 }
 0x1cf   : > { %v1436_v37 = vrot.slane %v1390_v32, %v865_v26 }
 0x22b   : > { %v1739_v47 = vpop.f32.mrb[0].mxu1 }
 0x22c   : > { %v1386_v48 = vadd.f32 %v1739_v47, %v2346_v45  ;;  %v1374_v49 = vpop.f32.mrb[1].mxu1 }
 0x22d   : > { %v1385_v50 = vadd.f32 %v1374_v49, %v2348_v46 }
 0x22e   : > { %v1392_v51 = vsel %vm899_vm1, %v1386_v48, 0.0 }
 0x22f   : > { %v1391_v52 = vsel %vm899_vm1, %v1385_v50, 0.0 }
 0x230   : > { %v1393_v53 = vadd.f32 %v1392_v51, %v1391_v52 }
 0x232   : > { %v1394_v54 = vrot.slane %v1393_v53, 4 }
 0x234   : > { %v1395_v55 = vadd.f32 %v1394_v54, %v1393_v53 }
 0x236   : > { %v1396_v56 = vrot.slane %v1395_v55, 2 }
 0x238   : > { %v1397_v57 = vadd.f32 %v1396_v56, %v1395_v55 }
 0x23a   : > { %v1398_v58 = vrot.slane %v1397_v57, 1 }
 0x23c   : > { %v1399_v59 = vadd.f32 %v1398_v58, %v1397_v57 }
 0x23e   : > { %v1400_v60 = vmul.f32 0.0625, %v1399_v59 }
 0x240   : > { %v1401_v61 = vsub.f32 %v1385_v50, %v1400_v60  ;;  %v1402_v62 = vsub.f32 %v1386_v48, %v1400_v60 }
 0x242   : > { %v1403_v63 = vmul.f32 %v1401_v61, %v1401_v61  ;;  %v1404_v2 = vmul.f32 %v1402_v62, %v1402_v62 }
 0x244   : > { %v1405_v3 = vsel %vm899_vm1, %v1403_v63, 0.0  ;;  %v1406_v4 = vsel %vm899_vm1, %v1404_v2, 0.0 }
 0x245   : > { %v1407_v5 = vadd.f32 %v1406_v4, %v1405_v3 }
 0x247   : > { %v1408_v6 = vrot.slane %v1407_v5, 4 }
 0x249   : > { %v1409_v7 = vadd.f32 %v1408_v6, %v1407_v5 }
 0x24b   : > { %v1410_v8 = vrot.slane %v1409_v7, 2 }
 0x24d   : > { %v1411_v9 = vadd.f32 %v1410_v8, %v1409_v7 }
 0x24f   : > { %v1412_v10 = vrot.slane %v1411_v9, 1 }
 0x251   : > { %v1413_v11 = vadd.f32 %v1412_v10, %v1411_v9 }
 0x253   : > { %v1414_v12 = vmul.f32 0.0625, %v1413_v11 }
 0x255   : > { %v1415_v13 = vadd.f32 1e-05, %v1414_v12 }
 0x257   : > { %1970 = vrsqrt.f32 %v1415_v13 }
 0x261   : > { %v1971_v16 = vpop.eup %1970 }
 0x262   : > { %v1417_v17 = vmul.f32 %v1971_v16, %v1401_v61  ;;  %v1418_v18 = vmul.f32 %v1971_v16, %v1402_v62 }
 0x264   : > { %v1419_v21 = vmul.f32 %v1417_v17, %v2356_v14  ;;  %v1420_v22 = vmul.f32 %v1418_v18, %v2358_v15 }
 0x266   : > { %v1421_v23 = vadd.f32 %v1419_v21, %v844_v19  ;;  %v1422_v24 = vadd.f32 %v1420_v22, %v848_v20 }
 0x268   : > { %v1425_v28 = vmul.f32 0.70710677, %v1421_v23  ;;  %v1426_v30 = vmul.f32 0.70710677, %v1422_v24  ;;  %v1423_v35 = vmul.f32 0.5, %v1421_v23  ;;  %v1424_v38 = vmul.f32 0.5, %v1422_v24 }
 0x26a   : > { %1972 = verf.f32 %v1425_v28 }
 0x26b   : > { %1974 = verf.f32 %v1426_v30 }
 0x274   : > { %v1973_v33 = vpop.eup %1972 }
 0x275   : > { %v1975_v34 = vpop.eup %1974  ;;  %v1429_v36 = vadd.f32 1.0, %v1973_v33 }
 0x276   : > { %v1430_v39 = vadd.f32 1.0, %v1975_v34 }
 0x277   : > { %v1431_v40 = vmul.f32 %v1429_v36, %v1423_v35 }
 0x278   : > { %v1432_v41 = vmul.f32 %v1430_v39, %v1424_v38 }
 0x279   : > { %v2366_v42 = vmul.f32 %v1436_v37, %v1431_v40 }
 0x27a   : > { %v2368_v43 = vmul.f32 %v1436_v37, %v1432_v41 }
 0x27b   : > { %1443 = vrot.lane.b32.xlu0 %v2366_v42, %s2110_s13 }
 0x27c   : > { %1445 = vrot.lane.b32.xlu1 %v2368_v43, %s2110_s13 }
 0x29e   : > { %v1704_v27 = vpop.f32.mrb[0].mxu0 }
 0x29f   : > { %v802_v0 = vadd.f32 %v1704_v27, %v2346_v45  ;;  %v780_v1 = vpop.f32.mrb[1].mxu0 }
 0x2a0   : > { %v801_v25 = vadd.f32 %v2348_v46, %v780_v1 }
 0x2a1   : > { %v805_v26 = vsel %vm352_vm3, %v802_v0, 0.0 }
 0x2a2   : > { %v804_v44 = vsel %vm352_vm3, %v801_v25, 0.0 }
 0x2a3   : > { %v806_v47 = vadd.f32 %v805_v26, %v804_v44 }
 0x2a5   : > { %v807_v48 = vrot.slane %v806_v47, 4 }
 0x2a7   : > { %v808_v49 = vadd.f32 %v807_v48, %v806_v47 }
 0x2a9   : > { %v809_v50 = vrot.slane %v808_v49, 2 }
 0x2ab   : > { %v810_v51 = vadd.f32 %v809_v50, %v808_v49 }
 0x2ad   : > { %v811_v52 = vrot.slane %v810_v51, 1 }
 0x2af   : > { %v812_v53 = vadd.f32 %v811_v52, %v810_v51 }
 0x2b1   : > { %v813_v54 = vmul.f32 0.0625, %v812_v53 }
 0x2b3   : > { %v814_v55 = vsub.f32 %v801_v25, %v813_v54  ;;  %v815_v56 = vsub.f32 %v802_v0, %v813_v54 }
 0x2b5   : > { %v816_v57 = vmul.f32 %v814_v55, %v814_v55  ;;  %v817_v58 = vmul.f32 %v815_v56, %v815_v56 }
 0x2b7   : > { %v818_v45 = vsel %vm352_vm3, %v816_v57, 0.0  ;;  %v819_v46 = vsel %vm352_vm3, %v817_v58, 0.0 }
 0x2b8   : > { %v820_v59 = vadd.f32 %v819_v46, %v818_v45 }
 0x2ba   : > { %v821_v60 = vrot.slane %v820_v59, 4 }
 0x2bc   : > { %v822_v61 = vadd.f32 %v821_v60, %v820_v59 }
 0x2be   : > { %v823_v62 = vrot.slane %v822_v61, 2 }
 0x2c0   : > { %v824_v63 = vadd.f32 %v823_v62, %v822_v61 }
 0x2c2   : > { %v825_v2 = vrot.slane %v824_v63, 1 }
 0x2c4   : > { %v826_v3 = vadd.f32 %v825_v2, %v824_v63 }
 0x2c6   : > { %v827_v4 = vmul.f32 0.0625, %v826_v3 }
 0x2c8   : > { %v828_v5 = vadd.f32 1e-05, %v827_v4 }
 0x2ca   : > { %1976 = vrsqrt.f32 %v828_v5 }
 0x2d4   : > { %v1977_v6 = vpop.eup %1976 }
 0x2d5   : > { %v830_v7 = vmul.f32 %v1977_v6, %v814_v55  ;;  %v831_v8 = vmul.f32 %v1977_v6, %v815_v56 }
 0x2d7   : > { %v840_v9 = vmul.f32 %v2356_v14, %v830_v7  ;;  %v841_v10 = vmul.f32 %v2358_v15, %v831_v8 }
 0x2d9   : > { %v850_v11 = vadd.f32 %v844_v19, %v840_v9  ;;  %v851_v12 = vadd.f32 %v848_v20, %v841_v10 }
 0x2db   : > { %v854_v13 = vmul.f32 0.70710677, %v850_v11  ;;  %v855_v16 = vmul.f32 0.70710677, %v851_v12  ;;  %v852_v21 = vmul.f32 0.5, %v850_v11  ;;  %v853_v23 = vmul.f32 0.5, %v851_v12 }
 0x2dd   : > { %1978 = verf.f32 %v854_v13 }
 0x2de   : > { %1980 = verf.f32 %v855_v16 }
 0x2e7   : > { %v1979_v17 = vpop.eup %1978 }
 0x2e8   : > { %v1981_v18 = vpop.eup %1980  ;;  %v858_v22 = vadd.f32 1.0, %v1979_v17 }
 0x2e9   : > { %v859_v24 = vadd.f32 1.0, %v1981_v18 }
 0x2ea   : > { %v860_v28 = vmul.f32 %v858_v22, %v852_v21 }
 0x2eb   : > { %v861_v30 = vmul.f32 %v859_v24, %v853_v23 }
 0x2ec   : > { %v868_v14 = vmul.f32 %v2326_v29, %v860_v28 }
 0x2ed   : > { %v869_v15 = vmul.f32 %v2326_v29, %v861_v30  ;;  %v1444_v19 = vpop.permute.xlu0 %1443 }
 0x2ee   : > { %870 = vst.msk [vmem:[%s298_s12] sm:$0xff] %vm352_vm3, %v868_v14  ;;  %v1446_v29 = vpop.permute.xlu1 %1445 }
 0x2ef   : > { %871 = vst.msk [vmem:[%s298_s12 + $0x8] sm:$0xff] %vm352_vm3, %v869_v15 }
 0x2f0   : > { %1439 = vst.msk [vmem:[%s298_s12] sm:$0xff] %vm882_vm2, %v2366_v42  ;;  %1440 = vst.msk [vmem:[%s298_s12 + $0x8] sm:$0xff] %vm882_vm2, %v2368_v43 }
 0x2f1   : > { %1450 = vst.msk [vmem:[%s298_s12] sm:$0xff] %vm1449_vm4, %v1444_v19  ;;  %1451 = vst.msk [vmem:[%s298_s12 + $0x8] sm:$0xff] %vm1449_vm4, %v1446_v29 }
 0x2f2   : > { %2023 = shalt.err (!%p2020_p6)
}
 0x2f3   : > { %s2024_s25 = scalar_lea.hbm %s2388_s10, 256  ;;  %s2028_s8 = scalar_lea.hbm %s2448_s5, 512 }
 0x2f4   : > { %p2025_p7 = scmp.ne.s32.totalorder %s2388_s10, %s2024_s25  ;;  %p2029_p0 = scmp.lt.u32.totalorder %s2388_s10, %s2448_s5 }
 0x2f5   : > { %p2030_p2 = scmp.lt.u32.totalorder %s2028_s8, %s2024_s25  ;;  %p2032_p8 = scmp.lt.u32.totalorder %s2024_s25, %s2388_s10 }
 0x2f6   : > { %p2026_p9 = pnand %p2025_p7, %p2460_p10 }
 0x2f7   : > { %p2031_p4 = por %p2030_p2, %p2029_p0 }
 0x2f8   : > { %p2027_p12 = pneg %p2026_p9 }
 0x2f9   : > { %p2033_p11 = por %p2032_p8, %p2031_p4 }
 0x2fb   : > { %p2034_p13 = pnand %p2033_p11, %p2027_p12 }
 0x2fd   : > { %2037 = shalt.err (!%p2034_p13)
}
 0x2fe   : > { %s2112_s12 = smov 128   ;;  %s2113_s14 = smov 8  }
 0x2ff   : > { %1800 = dma.vmem_to_hbm [thread:$0]  (%p2460_p10), %s2390_s11, 256, %s2388_s10, %s2397_s21, %s2112_s12, %s2112_s12, %s2113_s14  }
 0x300 PF: > { %p1812_p1 = scmp.ge.s32.totalorder %s2092_s23, 2  ;;  %s1482_s15 = sand.u32 1, %s2072_s18  }
 0x301   : > { %p2461_p3 = scmp.ne.s32.totalorder %s2454_s30, 0  ;;  %s1483_s16 = scalar_lea.sflag [#allocation4], %s1482_s15 }
 0x303   : > { %p1807_p5 = pnand %p1812_p1, %p2461_p3 }
 0x305   : > { %2067 = dma.done.wait (!%p1807_p5), %s1483_s16, 256  }
 0x306   : > { %2069 = vsyncadd (!%p1807_p5), %s1483_s16, 4294967040  ;;  %s19_s23 = sadd.s32 1, %s2092_s23   ;;  %s2462_s18 = smov %s2076_s19 }
 0x307   : > { %p16_p6 = scmp.ge.s32.totalorder %s19_s23, 4   ;;  %s2463_s19 = smov %s2080_s20 }
 0x308   : > { %s2464_s20 = smov %s2197_s6  ;;  %s2465_s21 = smov %s2088_s22 }
 0x309   : > { %s2466_s22 = smov %s2468_s26  ;;  %18 = sbr.rel (!%p16_p6) target bundleno = 5 (0x5), region = 90 }
 0x310   :  { %1488 = vsyncpa [#allocation3], 1 }
 0x311   :  { %1490 = vsyncpa [#allocation3 + $0x1], 1 }
 0x312   :  { %1491 = vsyncpa [#allocation4], 1 }
 0x313   :  { %1493 = vsyncpa [#allocation4 + $0x1], 1 }

</bundles_post_ra>
